<compile_context>
chip_gen: v7x
topology: tpu7x:2x2x1
jax: 0.10.0
libtpu: 0.0.40
codegen_flags: <defaults>
</compile_context>

<pallas_src>
import functools

import jax
import jax.numpy as jnp
import numpy as np
from jax.experimental import pallas as pl
from jax.experimental.pallas import tpu as pltpu


def _pick_f_tile(F, dim, vmem_budget_bytes=12 * 1024 * 1024):
    """Largest F-tile that divides F, keeps the double-buffered (x + W) tiles
    under `vmem_budget_bytes`, and is a multiple of 1024 (=> >=8 sublane rows)
    unless tf == F.  At production F=163840, dim=2 this returns tf=F (nk=1)."""
    def fits(tf):
        per_buffer = (1 + dim) * tf * 4          # x tile + W tile, f32
        return 2 * per_buffer <= vmem_budget_bytes
    if fits(F):
        return F
    tf = (vmem_budget_bytes // (2 * (1 + dim) * 4) // 1024) * 1024
    tf = max(tf, 1024)
    while tf >= 1024:
        if F % tf == 0 and fits(tf):
            return tf
        tf -= 1024
    return F  # fallback: single tile


def prepare_weights(W):
    """One-time re-layout of the stacked Linear weights to the lane-dense
    layout the kernel consumes: (num_linears, dim, F//128, 128).
    Do this once at model init / weight load, NOT per forward call."""
    num_linears, F, dim = W.shape
    assert F % 128 == 0, "feature size must be a multiple of 128"
    return jnp.transpose(W, (0, 2, 1)).reshape(num_linears, dim, F // 128, 128)


def _select_linear_kernel(nk, t_ref, x_ref, w_ref, o_ref):
    # t_ref: (B,) int32 in SMEM (scalar prefetch, used only by index_maps)
    # x_ref: (1, rows, 128)        -- one F-tile of one sample, lane-dense
    # w_ref: (1, dim, rows, 128)   -- matching F-tile of the selected Linear
    # o_ref: (1, dim, 128)         -- per-lane partial sums, resident across k
    xv = x_ref[0]                                          # (rows, 128)
    ps = jnp.sum(w_ref[0] * xv[None, :, :], axis=1)        # (dim, 128)
    if nk == 1:
        o_ref[0] = ps
    else:
        k = pl.program_id(1)

        @pl.when(k == 0)
        def _first():
            o_ref[0] = ps

        @pl.when(k > 0)
        def _accum():
            o_ref[0] += ps


def model_forward(x, t, w4, b, *, f_tile=None):
    """y[i] = x[i].reshape(-1) @ W[t[i]-1] + b[t[i]-1]

    x:  (B, ...) float32, F = prod(x.shape[1:]) must be a multiple of 128
    t:  (B,) int, 1-based layer indices in [1, num_linears]
    w4: (num_linears, dim, F//128, 128) float32  -- from prepare_weights(W)
    b:  (num_linears, dim) float32
    returns: (B, dim) float32
    """
    B = x.shape[0]
    F = int(np.prod(x.shape[1:]))
    num_linears, dim, f_blocks, lanes = w4.shape
    assert lanes == 128 and f_blocks * 128 == F, (w4.shape, F)
    assert F % 128 == 0, "feature size must be a multiple of 128"

    tf = f_tile if f_tile is not None else _pick_f_tile(F, dim)
    assert F % tf == 0 and tf % 128 == 0
    rows = tf // 128          # sublane rows per F-tile
    nk = F // tf              # number of F-tiles (reduction grid axis)

    # Lane-dense activation layout (free reshape: row-major, no data movement).
    x3 = x.reshape(B, F // 128, 128)
    # 0-based, clamped layer index (Pallas does not bounds-check block indices).
    t0 = jnp.clip(t.astype(jnp.int32) - 1, 0, num_linears - 1)

    w_spec_kwargs = {}
    if nk > 2:
        # Only relevant if VMEM forces small tiles; helps hide DMA on v5e.
        w_spec_kwargs["pipeline_mode"] = pl.Buffered(3)

    grid_spec = pltpu.PrefetchScalarGridSpec(
        num_scalar_prefetch=1,
        grid=(B, nk),
        in_specs=[
            pl.BlockSpec((1, rows, 128), lambda i, k, t_s: (i, k, 0)),
            pl.BlockSpec((1, dim, rows, 128),
                         lambda i, k, t_s: (t_s[i], 0, k, 0),
                         **w_spec_kwargs),
        ],
        out_specs=pl.BlockSpec((1, dim, 128), lambda i, k, t_s: (i, 0, 0)),
    )

    partial = pl.pallas_call(
        functools.partial(_select_linear_kernel, nk),
        out_shape=jax.ShapeDtypeStruct((B, dim, 128), jnp.float32),
        grid_spec=grid_spec,
        compiler_params=pltpu.CompilerParams(
            dimension_semantics=("parallel", "arbitrary")),
    )(t0, x3, w4)

    # Tiny epilogue (fused under jit): 128-way lane reduction + bias gather.
    return partial.sum(axis=-1) + b[t0]


if __name__ == "__main__":
    B = 2
    num_linears = 48
    dim = 2
    # Small stand-in for the real (B, 2, 1280, 8, 8): channels 1280 -> 4, so
    # F = 2*4*8*8 = 512 (a multiple of 128, like the real F = 2*1280*8*8).
    x_shape = (B, 2, 4, 8, 8)
    F = int(np.prod(x_shape[1:]))

    key = jax.random.PRNGKey(0)
    kx, kw, kb, kt = jax.random.split(key, 4)

    bound = 1.0 / float(np.sqrt(F))
    x = jax.random.normal(kx, x_shape, dtype=jnp.float32)
    W = jax.random.uniform(kw, (num_linears, F, dim), jnp.float32,
                           minval=-bound, maxval=bound)
    b = jax.random.uniform(kb, (num_linears, dim), jnp.float32,
                           minval=-bound, maxval=bound)
    t = jax.random.randint(kt, (B,), 1, num_linears + 1, dtype=jnp.int32)

    # One-time weight re-layout ("model init"), hoisted out of the hot path.
    w4 = jax.block_until_ready(prepare_weights(W))

    forward = jax.jit(model_forward)
    out = jax.block_until_ready(forward(x, t, w4, b))

    # numpy float64 reference (exact per-sample layer select + affine)
    xn = np.asarray(x, np.float64).reshape(B, -1)
    Wn = np.asarray(W, np.float64)
    bn = np.asarray(b, np.float64)
    tn = np.asarray(t)
    ref = np.stack([xn[i] @ Wn[tn[i] - 1] + bn[tn[i] - 1] for i in range(B)])

    np.testing.assert_allclose(np.asarray(out), ref, rtol=2e-4, atol=1e-5)
    print("KERNEL_OK")
</pallas_src>

<mosaic_0001>
module attributes {stable_mosaic.version = 11 : i64} {
  func.func @_select_linear_kernel(%arg0: i32, %arg1: i32, %arg2: memref<2xi32, #tpu.memory_space<smem>>, %arg3: memref<1x4x128xf32, #tpu.memory_space<vmem>>, %arg4: memref<1x2x4x128xf32, #tpu.memory_space<vmem>>, %arg5: memref<1x2x128xf32, #tpu.memory_space<vmem>>) attributes {dimension_semantics = [#tpu.dimension_semantics<parallel>, #tpu.dimension_semantics<arbitrary>], iteration_bounds = array<i64: 2, 1>, scalar_prefetch = 1 : i64, scratch_operands = 0 : i64, tpu.core_type = #tpu.core_type<tc>, window_params = [{transform_indices = @transform_0, window_bounds = array<i64: 1, 4, 128>}, {transform_indices = @transform_1, window_bounds = array<i64: 1, 2, 4, 128>}, {transform_indices = @transform_2, window_bounds = array<i64: 1, 2, 128>}]} {
    %c0 = arith.constant 0 : index
    %c0_0 = arith.constant 0 : index
    %c0_1 = arith.constant 0 : index
    %0 = vector.load %arg3[%c0, %c0_0, %c0_1] : memref<1x4x128xf32, #tpu.memory_space<vmem>>, vector<1x4x128xf32>
    %1 = vector.shape_cast %0 : vector<1x4x128xf32> to vector<4x128xf32>
    %c0_2 = arith.constant 0 : index
    %c0_3 = arith.constant 0 : index
    %c0_4 = arith.constant 0 : index
    %c0_5 = arith.constant 0 : index
    %2 = vector.load %arg4[%c0_2, %c0_3, %c0_4, %c0_5] : memref<1x2x4x128xf32, #tpu.memory_space<vmem>>, vector<1x2x4x128xf32>
    %3 = vector.shape_cast %2 : vector<1x2x4x128xf32> to vector<2x4x128xf32>
    %4 = vector.shape_cast %1 : vector<4x128xf32> to vector<1x4x128xf32>
    %5 = vector.broadcast %4 : vector<1x4x128xf32> to vector<2x4x128xf32>
    %6 = arith.mulf %3, %5 : vector<2x4x128xf32>
    %cst = arith.constant dense<0.000000e+00> : vector<2x128xf32>
    %7 = vector.multi_reduction <add>, %6, %cst [1] : vector<2x4x128xf32> to vector<2x128xf32>
    %c0_6 = arith.constant 0 : index
    %c0_7 = arith.constant 0 : index
    %c0_8 = arith.constant 0 : index
    %8 = vector.load %arg5[%c0_6, %c0_7, %c0_8] : memref<1x2x128xf32, #tpu.memory_space<vmem>>, vector<1x2x128xf32>
    %9 = vector.shape_cast %8 : vector<1x2x128xf32> to vector<2x128xf32>
    %10 = vector.shape_cast %7 : vector<2x128xf32> to vector<1x2x128xf32>
    tpu.vector_store %arg5[%c0_6, %c0_7, %c0_8], %10 {strides = array<i32>} : memref<1x2x128xf32, #tpu.memory_space<vmem>>, vector<1x2x128xf32>,
    return
  }
  func.func @transform_0(%arg0: i32, %arg1: i32, %arg2: memref<2xi32, #tpu.memory_space<smem>>) -> (i32, i32, i32) {
    %c0_i32 = arith.constant 0 : i32
    %c0_i32_0 = arith.constant 0 : i32
    return %arg0, %arg1, %c0_i32 : i32, i32, i32
  }
  func.func @transform_1(%arg0: i32, %arg1: i32, %arg2: memref<2xi32, #tpu.memory_space<smem>>) -> (i32, i32, i32, i32) {
    %0 = arith.index_cast %arg0 : i32 to index
    %1 = memref.load %arg2[%0] : memref<2xi32, #tpu.memory_space<smem>>
    %c0_i32 = arith.constant 0 : i32
    %c0_i32_0 = arith.constant 0 : i32
    %c0_i32_1 = arith.constant 0 : i32
    return %1, %c0_i32, %arg1, %c0_i32_0 : i32, i32, i32, i32
  }
  func.func @transform_2(%arg0: i32, %arg1: i32, %arg2: memref<2xi32, #tpu.memory_space<smem>>) -> (i32, i32, i32) {
    %c0_i32 = arith.constant 0 : i32
    %c0_i32_0 = arith.constant 0 : i32
    %c0_i32_1 = arith.constant 0 : i32
    return %arg0, %c0_i32, %c0_i32_0 : i32, i32, i32
  }
}

</mosaic_0001>

<bundles_post_ra>
// kernel: model_forward.1
= control target key start
LH: loop header
LB: loop body
LE: loop exit
PB: predicated region body
PF: predicated region fallthrough
CT: control target
= control target key end

     0   :  { %s658_s0 = inlined_call_operand.vmem [shape: s32[2], index: 0, kind: input, shape index: {}]   ;;  %s659_s1 = inlined_call_operand.vmem [shape: f32[2,4,128], index: 1, kind: input, shape index: {}]   ;;  %s660_s2 = inlined_call_operand.hbm [shape: f32[48,2,4,128], index: 2, kind: input, shape index: {}]   ;;  %s661_s3 = inlined_call_operand.vmem [shape: f32[2,2,128], index: 3, kind: output, shape index: {}]  }
   0x1   :  { %s8_s14 = sshll.u32 %s658_s0, 4  ;;  %s9_s14 = int_to_ptr.vmem [resolvable:$true] %s8_s14 }
   0x2   :  { %s408_s15 = scalar_lea.vmem %s9_s14, 16  ;;  %p413_p1 = scmp.lt.s32.totalorder %s9_s14, %s9_s14 }
   0x3   :  { %p409_p0 = scmp.ne.s32.totalorder %s9_s14, %s408_s15  ;;  %p414_p2 = scmp.lt.s32.totalorder %s408_s15, %s408_s15 }
   0x5   :  { %p415_p3 = por %p414_p2, %p413_p1 }
   0x7   :  { %p416_p4 = pnand %p415_p3, %p409_p0 }
   0x9   :  { %419 = shalt.err (!%p416_p4)  }
   0xa   :  { %s504_s16 = smov [#allocation3]  }
   0xb   :  { %11 = dma.vmem_to_smem %s9_s14, 16, %s504_s16, [#allocation2] }
   0xc   :  { %474 = dma.done.wait [#allocation2], 16 }
   0xd   :  { %475 = vsyncadd [#allocation2], 4294967280 }
   0xe   :  { %13 = sfence }
   0xf   :  { %14 = vsyncpa [#allocation5], 0 }
  0x10   :  { %16 = vsyncpa [#allocation5 + $0x1], 0  ;;  %s531_s17 = smov 0   ;;  %s533_s18 = smov 0  }
  0x11   :  { %s535_s0 = smov 0   ;;  %s537_s19 = smov 0  }
  0x12   :  { %s539_s20 = smov 0   ;;  %s541_s21 = smov 0  }
  0x13 LB: > { %s34_s22 = sadd.s32 1, %s498_s20  ;;  %s332_s23 = sadd.s32 4294967295, %s502_s21   ;;  %s502_s21 = sphi %s541_s21, %s22_s21   ;;  %s498_s20 = sphi %s539_s20, %s671_s20   ;;  %s494_s19 = sphi %s537_s19, %s670_s19   ;;  %s490_s0 = sphi %s535_s0, %s669_s0   ;;  %s486_s18 = sphi %s533_s18, %s668_s18   ;;  %s482_s17 = sphi %s531_s17, %s667_s17  }
  0x14   : > { %p36_p5 = scmp.ge.s32.totalorder %s34_s22, 2  ;;  %s66_s24 = sld [smem:[#allocation3 + %s498_s20]] }
  0x15   : > { %p80_p6 = scmp.ne.s32.totalorder %s490_s0, %s486_s18  ;;  %p81_p7 = scmp.eq.s32.totalorder %s502_s21, 0 }
  0x16   : > { %s673_s22 = smov (%p36_p5, %s34_s22), 0  ;;  %p86_p8 = scmp.ne.s32.totalorder %s486_s18, %s482_s17 }
  0x17   : > { %s67_s25 = sld [smem:[#allocation3 + %s673_s22]]  ;;  %p87_p9 = scmp.eq.s32.totalorder %s332_s23, 0 }
  0x18   : > { %s146_s27 = sand.u32 1, %s490_s0   ;;  %p82_p11 = por %p81_p7, %p80_p6 }
  0x19   : > { %p569_p10 = por %p87_p9, %p86_p8  ;;  %s73_s28 = sadd.s32 1, %s490_s0 }
  0x1a   : > { %p356_p12 = scmp.lt.s32.totalorder %s502_s21, 2  ;;  %s336_s30 = sshll.u32 %s146_s27, 3 }
  0x1b   : > { %s663_s26 = scalar_select %p569_p10, 1, 0 }
  0x1c   : > { %p576_p0 = pnand %p356_p12, %p82_p11  ;;  %p339_p1 = scmp.ge.s32.totalorder %s502_s21, 1 }
  0x1d   : > { %s68_s29 = ssub.s32 %s66_s24, %s67_s25  ;;  %p167_p2 = scmp.lt.s32.totalorder %s502_s21, 3 }
  0x1e   : > { %p71_p13 = scmp.eq.s32.totalorder %s68_s29, 0  ;;  %s150_s9 = scalar_lea.vmem [#allocation4], %s336_s30 }
  0x1f   : > { %s346_s5 = scalar_select %p82_p11, [#allocation3], [#allocation6] }
  0x20   : > { %s581_s6 = scalar_select %p71_p13, %s490_s0, %s73_s28  }
  0x21   : > { %s347_s7 = scalar_select %p82_p11, %s498_s20, 0 }
  0x22   : > { %s675_s5 = smov (!%p356_p12, %s346_s5), [#allocation7]  ;;  %s159_s10 = sshll.u32 %s150_s9, 4  ;;  %s590_s10 = int_to_ptr.vmem [resolvable:$true] %s159_s10 }
  0x23   : > { %s677_s7 = smov (!%p356_p12, %s347_s7), 0  ;;  %p586_p3 = pnand %p339_p1, %p167_p2 }
  0x24   : > { %s151_s8 = sld [smem:[%s675_s5 + %s677_s7]]  ;;  %s597_s16 = scalar_lea.sflag [#allocation5], %s146_s27 }
  0x25   : > { %p422_p5 = pneg %p576_p0  ;;  %s425_s25 = scalar_lea.hbm %s660_s2, 6144 }
  0x2a   : > { %s345_s12 = sshll.u32 %s151_s8, 7 }
  0x2b   : > { %s595_s15 = scalar_lea.hbm %s660_s2, %s345_s12 }
  0x2c   : > { %s420_s17 = scalar_lea.hbm %s595_s15, 128  ;;  %p426_p8 = scmp.lt.u32.totalorder %s595_s15, %s660_s2 }
  0x2d   : > { %p421_p4 = scmp.ne.s32.totalorder %s595_s15, %s420_s17  ;;  %p427_p9 = scmp.lt.u32.totalorder %s425_s25, %s420_s17 }
  0x2e   : > { %p429_p12 = scmp.lt.u32.totalorder %s420_s17, %s595_s15 }
  0x2f   : > { %p423_p6 = pnand %p422_p5, %p421_p4  ;;  %p428_p11 = por %p427_p9, %p426_p8 }
  0x31   : > { %p424_p7 = pneg %p423_p6  ;;  %p430_p13 = por %p429_p12, %p428_p11 }
  0x33   : > { %p431_p1 = pnand %p430_p13, %p424_p7 }
  0x35   : > { %434 = shalt.err (!%p431_p1)
}
  0x36   : > { %s435_s27 = scalar_lea.vmem %s590_s10, 128  ;;  %s505_s30 = smov [#allocation4]  }
  0x37   : > { %p436_p2 = scmp.ne.s32.totalorder %s590_s10, %s435_s27  ;;  %s440_s5 = sshll.u32 %s505_s30, 4  ;;  %s441_s5 = int_to_ptr.vmem [resolvable:$false] %s440_s5 }
  0x38   : > { %s442_s7 = scalar_lea.vmem %s441_s5, 256  ;;  %p443_p10 = scmp.lt.s32.totalorder %s590_s10, %s441_s5 }
  0x39   : > { %p438_p4 = pnand %p436_p2, %p422_p5  ;;  %p444_p8 = scmp.lt.s32.totalorder %s442_s7, %s435_s27 }
  0x3b   : > { %p439_p6 = pneg %p438_p4  ;;  %p445_p9 = por %p444_p8, %p443_p10 }
  0x3d   : > { %p446_p11 = pnand %p445_p9, %p439_p6 }
  0x3f   : > { %449 = shalt.err (!%p446_p11)
}
  0x40   : > { %s506_s8 = smov 64   ;;  %s507_s9 = smov 4  }
  0x41   : > { %355 = dma.hbm_to_vmem [thread:$0]  (!%p576_p0), %s595_s15, 128, %s590_s10, %s597_s16, %s506_s8, %s506_s8, %s507_s9  }
  0x42   : > { %171 = sbr.rel (%p586_p3) target bundleno = 97 (0x61), region = 28  ;;  %s173_s12 = sand.u32 (!%p586_p3), 1, %s486_s18  }
  0x43   : > { %s340_s13 = sshll.u32 (!%p586_p3), %s173_s12, 3  ;;  %s174_s14 = scalar_lea.sflag (!%p586_p3), [#allocation5], %s173_s12 }
  0x44   : > { %s177_s17 = scalar_lea.vmem (!%p586_p3), [#allocation4], %s340_s13  ;;  %p666_p10 = scmp.ne.s32.totalorder (!%p586_p3), %s663_s26, 0 }
  0x49   : > { %477 = dma.done.wait (%p666_p10), %s174_s14, 128  }
  0x4a   : > { %479 = vsyncadd (%p666_p10), %s174_s14, 4294967168  ;;  %p204_p5 = scmp.lt.s32.totalorder %s494_s19, 1  ;;  %vm221_vm0 = vcmask 1043456   ;;  %v217_v1 = vld [vmem:[%s177_s17] sm:$0xf]  ;;  %vm238_vm1 = vcmask 1041409  }
  0x4b   : > { %v218_v2 = vld [vmem:[%s177_s17 + $0x4] sm:$0xf] }
  0x4c   : > { %s679_s19 = smov (!%p204_p5, %s494_s19), 1 }
  0x4d   : > { %s341_s4 = sshll.u32 %s679_s19, 2  ;;  %s342_s26 = sshll.u32 %s679_s19, 1 }
  0x4e   : > { %s210_s11 = scalar_lea.vmem %s659_s1, %s341_s4  ;;  %s215_s24 = scalar_lea.vmem %s661_s3, %s342_s26 }
  0x4f   : > { %v216_v0 = vld [vmem:[%s210_s11] sm:$0xf] }
  0x50   : > { %v219_v3 = vmul.f32 %v217_v1, %v216_v0  ;;  %v220_v4 = vmul.f32 %v218_v2, %v216_v0 }
  0x52   : > { %v222_v5 = vsel %vm221_vm0, %v219_v3, 0.0  ;;  %v229_v6 = vsel %vm221_vm0, %v220_v4, 0.0 }
  0x53   : > { %v223_v7 = vrot.slane %v222_v5, 4  ;;  %v230_v8 = vrot.slane %v229_v6, 4 }
  0x55   : > { %v224_v9 = vadd.f32 %v223_v7, %v222_v5  ;;  %v231_v10 = vadd.f32 %v230_v8, %v229_v6 }
  0x57   : > { %v225_v11 = vrot.slane %v224_v9, 2  ;;  %v232_v12 = vrot.slane %v231_v10, 2 }
  0x59   : > { %v226_v13 = vadd.f32 %v225_v11, %v224_v9  ;;  %v233_v14 = vadd.f32 %v232_v12, %v231_v10 }
  0x5b   : > { %v227_v15 = vrot.slane %v226_v13, 1  ;;  %v234_v16 = vrot.slane %v233_v14, 1 }
  0x5d   : > { %v228_v17 = vadd.f32 %v227_v15, %v226_v13  ;;  %v235_v18 = vadd.f32 %v234_v16, %v233_v14 }
  0x5f   : > { %v239_v19 = vsel %vm238_vm1, %v235_v18, %v228_v17 }
  0x60   : > { %241 = vst [vmem:[%s215_s24] sm:$0x3] %v239_v19 }
  0x61 PF: > { %s22_s21 = sadd.s32 1, %s502_s21   ;;  %s667_s17 = smov %s486_s18 }
  0x62   : > { %p19_p0 = scmp.ge.s32.totalorder %s22_s21, 4   ;;  %s668_s18 = smov %s490_s0 }
  0x63   : > { %s669_s0 = smov %s581_s6  ;;  %s670_s19 = smov %s498_s20 }
  0x64   : > { %s671_s20 = smov %s673_s22  ;;  %21 = sbr.rel (!%p19_p0) target bundleno = 19 (0x13), region = 71 }
  0x6b   :  { %261 = vsyncpa [#allocation5], 1 }
  0x6c   :  { %263 = vsyncpa [#allocation5 + $0x1], 1 }

</bundles_post_ra>
